<compile_context>
chip_gen: v7x
topology: tpu7x:2x2x1
jax: 0.10.0
libtpu: 0.0.40
codegen_flags: <defaults>
</compile_context>

<pallas_src>
import functools

import numpy as np
import jax
import jax.numpy as jnp
from jax.experimental import pallas as pl
from jax.experimental.pallas import tpu as pltpu


# ----------------------------- Pallas kernels ------------------------------

def _holes_kernel(lam_ref, mpad_ref, sholes_ref, csum_ref, *, block_size):
    """Separable max_pool2d(kernel=(b,b), stride=1, pad=b//2) on the (C,H,W)
    bernoulli mask, plus the holes-sum reduction and the (1 - lam) pre-scale.

    lam_ref   : (1,) SMEM float32 — mixing coefficient lambda.
    mpad_ref  : (C, H+2p, W+2p) zero-padded mask.  Zero padding stands in for
                -inf padding; valid ONLY because the mask is in {0,1} (every
                pooling window contains >= 1 in-bounds value >= 0).
    sholes_ref: (C, H, W) = (1 - lam) * max_pool(mask), cast to compute dtype.
    csum_ref  : (1,) SMEM float32 = unscaled holes.sum() (changed pixels).
    """
    C, Hp, Wp = mpad_ref.shape
    p = block_size // 2
    H = Hp - 2 * p
    W = Wp - 2 * p

    mp = mpad_ref[...].astype(jnp.float32)          # (C, H+2p, W+2p)

    # 1) pool along H (sublane axis): (C, H, W+2p)
    acc_h = mp[:, 0:H, :]
    for dy in range(1, block_size):
        acc_h = jnp.maximum(acc_h, mp[:, dy:dy + H, :])

    # 2) pool along W (lane axis): (C, H, W)
    # TODO(synk): lane-axis shifts could use pltpu.roll + iota bounds masks to
    # avoid the XLA-side pad; mask is batch-shared and tiny (off the hot path).
    acc = acc_h[:, :, 0:W]
    for dx in range(1, block_size):
        acc = jnp.maximum(acc, acc_h[:, :, dx:dx + W])

    csum_ref[0] = jnp.sum(acc)                              # f32 accumulation
    sholes_ref[...] = ((1.0 - lam_ref[0]) * acc).astype(sholes_ref.dtype)


def _mix_kernel(idx_ref, x_ref, xs_ref, sh_ref, o_ref):
    """Soft PatchUp mix on lane-dense flattened blocks.

    out = (1-h)*x + lam*h*x + (1-lam)*h*x[indices]
        = x + (1-lam)*h*(x[indices] - x)
        = x + sholes * (x_shuf - x)          (sholes pre-scaled by 1 - lam)

    idx_ref : (B,) SMEM int32 scalar-prefetch (consumed by the index_maps).
    x_ref   : (1, rt, 128) block of x for batch element b.
    xs_ref  : (1, rt, 128) block of x for batch element indices[b].
    sh_ref  : (rt, 128)   batch-shared pre-scaled holes block (compute dtype).
    """
    sh = sh_ref[...]
    cdt = sh.dtype                                   # compute dtype (f32/bf16)
    x = x_ref[...].astype(cdt)
    xs = xs_ref[...].astype(cdt)
    o_ref[...] = (x + sh * (xs - x)).astype(o_ref.dtype)


# --------------------------- hardware-aware tiling ---------------------------

def _tpu_vmem_capacity_bytes():
    try:
        return int(pltpu.get_tpu_info().vmem_capacity_bytes)
    except Exception:
        return 64 * 1024 * 1024          # conservative (v7x-sized) fallback


def _device_kind():
    try:
        return jax.devices()[0].device_kind.lower()
    except Exception:
        return ""


def _supports_bf16_valu():
    # v2-v5 have no bf16 VALU; assume bf16 VALU on anything newer.
    kind = _device_kind()
    return not any(g in kind for g in ("v2", "v3", "v4", "v5"))


def _mix_compute_dtype(x_dtype):
    if x_dtype == jnp.bfloat16 and _supports_bf16_valu():
        return jnp.bfloat16              # bf16-native mix on v6e / v7x
    return jnp.float32


def _pick_row_block(R, bytes_per_row, sublane, target_bytes):
    """Rows per feature block: multiple of the dtype's sublane packing (8 f32,
    16 bf16, 32 int8) or all of R, sized so one x-block is ~target_bytes."""
    if R <= sublane:
        return R
    rows = max(sublane, int(target_bytes // bytes_per_row))
    rows = min(R, rows)
    return max(sublane, (rows // sublane) * sublane)


# ------------------------------ wrappers ------------------------------------

def compute_scaled_holes(m, lam, block_size, out_dtype=jnp.float32):
    """Pallas separable max-pool of the mask, (1-lam) pre-scale, and the
    total-changed-pixels sum.  The mask is batch-shared and tiny."""
    C, H, W = m.shape
    p = block_size // 2
    # Batch-shared mask pad: O(C*H*W) bytes, ~1/B of the main HBM traffic.
    mpad = jnp.pad(m, ((0, 0), (p, p), (p, p)))
    lam_arr = jnp.asarray(lam, jnp.float32).reshape(1)
    sholes, csum = pl.pallas_call(
        functools.partial(_holes_kernel, block_size=block_size),
        out_shape=(
            jax.ShapeDtypeStruct((C, H, W), out_dtype),
            jax.ShapeDtypeStruct((1,), jnp.float32),
        ),
        in_specs=[
            pl.BlockSpec(memory_space=pltpu.MemorySpace.SMEM),   # lam
            pl.BlockSpec(memory_space=pltpu.MemorySpace.VMEM),   # padded mask
        ],
        out_specs=(
            pl.BlockSpec(memory_space=pltpu.MemorySpace.VMEM),   # sholes
            pl.BlockSpec(memory_space=pltpu.MemorySpace.SMEM),   # csum
        ),
    )(lam_arr, mpad)
    return sholes, csum[0]


def patchup_mix(x, sholes, indices, *, lane=128):
    """Lane-dense Soft-PatchUp mix.  Grid = (feature_blocks, batch); the
    shuffled operand is an index_map view of x driven by scalar-prefetched
    `indices` (no materialized gather)."""
    B = x.shape[0]
    N = int(np.prod(x.shape[1:]))
    R = pl.cdiv(N, lane)
    n_pad = R * lane - N

    x_flat = x.reshape(B, N)
    sh_flat = sholes.reshape(N)
    if n_pad:
        # TODO(synk): rare N % 128 != 0 fallback adds an extra pad + slice
        # pass over x; a pad-free masked-tail path without giving up the
        # lane-dense (rt, 128) layout is left unimplemented.
        x_flat = jnp.pad(x_flat, ((0, 0), (0, n_pad)))
        sh_flat = jnp.pad(sh_flat, (0, n_pad))
    x3 = x_flat.reshape(B, R, lane)                  # free reshape (row-major)
    sh2 = sh_flat.reshape(R, lane)

    # --- generation-aware block sizing + VMEM budget ---
    xi = np.dtype(x.dtype).itemsize
    ci = np.dtype(sholes.dtype).itemsize
    sublane = 8 * max(1, 4 // xi)                    # 8 f32 / 16 bf16 / 32 i8
    vmem_cap = _tpu_vmem_capacity_bytes()
    kind = _device_kind()
    if vmem_cap >= 100 * 1024 * 1024:                # v5e / v6e (128 MiB VMEM)
        target_bytes = (2 << 20) if "v5" in kind else (4 << 20)
    else:                                            # v7x (64 MiB VMEM)
        target_bytes = 3 << 20
    budget = (vmem_cap * 3) // 4

    rt = _pick_row_block(R, lane * xi, sublane, target_bytes)

    def _need(rows):
        # double-buffered: 2 x-blocks + 1 out-block (dtype of x) + 1 sholes
        # block (compute dtype), plus compiler-scratch headroom.
        return 2 * (3 * rows * lane * xi + rows * lane * ci) + (2 << 20)

    while rt > sublane and _need(rt) > budget:
        rt = max(sublane, ((rt // 2) // sublane) * sublane)
    vmem_limit = int(min(max(_need(rt), 16 << 20), max(_need(rt), budget)))

    num_j = pl.cdiv(R, rt)
    idx = indices.astype(jnp.int32)

    grid_spec = pltpu.PrefetchScalarGridSpec(
        num_scalar_prefetch=1,
        grid=(num_j, B),                             # batch innermost: sholes
        in_specs=[                                   # block stays resident
            pl.BlockSpec((1, rt, lane), lambda j, b, idx_ref: (b, j, 0)),
            pl.BlockSpec((1, rt, lane), lambda j, b, idx_ref: (idx_ref[b], j, 0)),
            # TODO(synk): pipeline_mode=pl.Buffered(1) would drop the
            # redundant second buffer of this batch-shared operand; kept
            # default-buffered (footprint is accounted in vmem_limit).
            pl.BlockSpec((rt, lane), lambda j, b, idx_ref: (j, 0)),
        ],
        out_specs=pl.BlockSpec((1, rt, lane), lambda j, b, idx_ref: (b, j, 0)),
    )
    # NOTE: no input_output_aliases(x -> out): later grid steps read
    # x[indices[b]] so aliasing would create a read-after-write hazard.
    out3 = pl.pallas_call(
        _mix_kernel,
        out_shape=jax.ShapeDtypeStruct((B, R, lane), x.dtype),
        grid_spec=grid_spec,
        compiler_params=pltpu.CompilerParams(
            dimension_semantics=("parallel", "parallel"),
            vmem_limit_bytes=vmem_limit),
    )(idx, x3, x3, sh2)

    out_flat = out3.reshape(B, R * lane)
    if n_pad:
        out_flat = out_flat[:, :N]
    return out_flat.reshape(x.shape)


def patchup_soft_forward(x, targets, key, lam=None, block_size=7, gamma=0.9):
    """Training-mode Soft PatchUp forward (torch/np RNG -> jax.random)."""
    # TODO(synk): PatchUpMode.HARD branch and the 1-D-mask (mask_shape == 1)
    # branch of the PyTorch module are not implemented (SOFT / 4-D only).
    B, C, H, W = x.shape
    k_lam, k_mask, k_perm = jax.random.split(key, 3)

    if lam is None:
        lam = jax.random.beta(k_lam, 2.0, 2.0)       # np.random.beta(2, 2)
    lam = jnp.asarray(lam, jnp.float32)

    # adjust_gamma — faithful to the PyTorch module (assumes H == W).
    gamma_adj = gamma * (W ** 2) / (block_size ** 2 * (W - block_size + 1) ** 2)

    # p = ones_like(x[0]) * gamma_adj ; m_i_j = bernoulli(p)  (batch-shared)
    m = jax.random.bernoulli(k_mask, p=gamma_adj, shape=(C, H, W)).astype(jnp.float32)

    # holes = max_pool2d(m, (b,b), 1, b//2); sum + (1-lam) pre-scale in-kernel
    compute_dtype = _mix_compute_dtype(x.dtype)
    sholes, total_changed_pixels = compute_scaled_holes(
        m, lam, block_size, out_dtype=compute_dtype)

    # random pairing of samples (np.random.permutation)
    indices = jax.random.permutation(k_perm, B).astype(jnp.int32)
    target_shuffled = targets[indices]

    total_feats = C * H ** 2        # faithful to PyTorch (assumes H == W)
    total_changed_portion = total_changed_pixels / total_feats
    total_unchanged_portion = (total_feats - total_changed_pixels) / total_feats

    # hot path: Pallas mixing kernel (gather done via scalar-prefetch view)
    x_out = patchup_mix(x, sholes, indices)

    target_a = targets
    target_reweighted = (total_unchanged_portion * targets
                         + lam * total_changed_portion * targets
                         + target_shuffled * (1.0 - lam) * total_changed_portion)
    target_b = lam * targets + (1.0 - lam) * target_shuffled

    return target_a, target_b, target_reweighted, x_out, total_unchanged_portion


# ------------------------------ reference -----------------------------------

def _ref_forward(x, targets, m, indices, lam, block_size):
    """Pure-JAX reference of the same forward (same mask / perm / lam)."""
    B, C, H, W = x.shape
    p = block_size // 2
    holes = jax.lax.reduce_window(
        m, -jnp.inf, jax.lax.max,
        window_dimensions=(1, block_size, block_size),
        window_strides=(1, 1, 1),
        padding=((0, 0), (p, p), (p, p)))
    holes_b = jnp.broadcast_to(holes, (B, C, H, W))
    mask = 1.0 - holes_b
    unchanged = mask * x
    total_feats = C * H ** 2
    changed = holes_b[0].sum()
    tc = changed / total_feats
    tu = (total_feats - changed) / total_feats
    patches = holes_b * x
    patches = patches * lam + patches[indices] * (1.0 - lam)
    x_out = unchanged + patches
    tr = tu * targets + lam * tc * targets + targets[indices] * (1.0 - lam) * tc
    tb = lam * targets + (1.0 - lam) * targets[indices]
    return targets, tb, tr, x_out, tu


# -------------------------------- main ---------------------------------------

if __name__ == "__main__":
    B, C, H, W = 2, 4, 16, 16
    NUM_CLASSES = 5
    BLOCK_SIZE = 7
    GAMMA = 0.9

    key = jax.random.PRNGKey(0)
    k_x, k_t, k_fwd = jax.random.split(key, 3)

    x = jax.random.normal(k_x, (B, C, H, W), dtype=jnp.float32)
    labels = jax.random.randint(k_t, (B,), 0, NUM_CLASSES)
    targets = jax.nn.one_hot(labels, NUM_CLASSES, dtype=jnp.float32)

    ta, tb, tr, x_out, tu = patchup_soft_forward(
        x, targets, k_fwd, lam=None, block_size=BLOCK_SIZE, gamma=GAMMA)
    jax.block_until_ready((ta, tb, tr, x_out, tu))

    # Cross-check against a pure-JAX reference using the same RNG draws.
    k_lam, k_mask, k_perm = jax.random.split(k_fwd, 3)
    lam = jax.random.beta(k_lam, 2.0, 2.0)
    gamma_adj = GAMMA * (W ** 2) / (BLOCK_SIZE ** 2 * (W - BLOCK_SIZE + 1) ** 2)
    m = jax.random.bernoulli(k_mask, p=gamma_adj, shape=(C, H, W)).astype(jnp.float32)
    indices = jax.random.permutation(k_perm, B)
    ref = _ref_forward(x, targets, m, indices, lam, BLOCK_SIZE)

    np.testing.assert_allclose(np.asarray(x_out), np.asarray(ref[3]),
                               rtol=1e-5, atol=1e-5)
    np.testing.assert_allclose(np.asarray(tr), np.asarray(ref[2]),
                               rtol=1e-5, atol=1e-5)
    np.testing.assert_allclose(np.asarray(tb), np.asarray(ref[1]),
                               rtol=1e-5, atol=1e-5)
    np.testing.assert_allclose(float(tu), float(ref[4]), rtol=1e-6, atol=1e-6)

    print("KERNEL_OK")
</pallas_src>

<mosaic_0001>
module attributes {stable_mosaic.version = 11 : i64} {
  func.func @_holes_kernel(%arg0: memref<1xf32, #tpu.memory_space<smem>>, %arg1: memref<4x22x22xf32, #tpu.memory_space<vmem>>, %arg2: memref<4x16x16xf32, #tpu.memory_space<vmem>>, %arg3: memref<1xf32, #tpu.memory_space<smem>>) attributes {dimension_semantics = [], scalar_prefetch = 0 : i64, scratch_operands = 0 : i64, tpu.core_type = #tpu.core_type<tc>} {
    %c0 = arith.constant 0 : index
    %c0_0 = arith.constant 0 : index
    %c0_1 = arith.constant 0 : index
    %0 = vector.load %arg1[%c0, %c0_0, %c0_1] : memref<4x22x22xf32, #tpu.memory_space<vmem>>, vector<4x22x22xf32>
    %1 = vector.extract_strided_slice %0 {offsets = [0, 0, 0], sizes = [4, 16, 22], strides = [1, 1, 1]} : vector<4x22x22xf32> to vector<4x16x22xf32>
    %2 = vector.extract_strided_slice %0 {offsets = [0, 1, 0], sizes = [4, 16, 22], strides = [1, 1, 1]} : vector<4x22x22xf32> to vector<4x16x22xf32>
    %3 = arith.maximumf %1, %2 : vector<4x16x22xf32>
    %4 = vector.extract_strided_slice %0 {offsets = [0, 2, 0], sizes = [4, 16, 22], strides = [1, 1, 1]} : vector<4x22x22xf32> to vector<4x16x22xf32>
    %5 = arith.maximumf %3, %4 : vector<4x16x22xf32>
    %6 = vector.extract_strided_slice %0 {offsets = [0, 3, 0], sizes = [4, 16, 22], strides = [1, 1, 1]} : vector<4x22x22xf32> to vector<4x16x22xf32>
    %7 = arith.maximumf %5, %6 : vector<4x16x22xf32>
    %8 = vector.extract_strided_slice %0 {offsets = [0, 4, 0], sizes = [4, 16, 22], strides = [1, 1, 1]} : vector<4x22x22xf32> to vector<4x16x22xf32>
    %9 = arith.maximumf %7, %8 : vector<4x16x22xf32>
    %10 = vector.extract_strided_slice %0 {offsets = [0, 5, 0], sizes = [4, 16, 22], strides = [1, 1, 1]} : vector<4x22x22xf32> to vector<4x16x22xf32>
    %11 = arith.maximumf %9, %10 : vector<4x16x22xf32>
    %12 = vector.extract_strided_slice %0 {offsets = [0, 6, 0], sizes = [4, 16, 22], strides = [1, 1, 1]} : vector<4x22x22xf32> to vector<4x16x22xf32>
    %13 = arith.maximumf %11, %12 : vector<4x16x22xf32>
    %14 = vector.extract_strided_slice %13 {offsets = [0, 0, 0], sizes = [4, 16, 16], strides = [1, 1, 1]} : vector<4x16x22xf32> to vector<4x16x16xf32>
    %15 = vector.extract_strided_slice %13 {offsets = [0, 0, 1], sizes = [4, 16, 16], strides = [1, 1, 1]} : vector<4x16x22xf32> to vector<4x16x16xf32>
    %16 = arith.maximumf %14, %15 : vector<4x16x16xf32>
    %17 = vector.extract_strided_slice %13 {offsets = [0, 0, 2], sizes = [4, 16, 16], strides = [1, 1, 1]} : vector<4x16x22xf32> to vector<4x16x16xf32>
    %18 = arith.maximumf %16, %17 : vector<4x16x16xf32>
    %19 = vector.extract_strided_slice %13 {offsets = [0, 0, 3], sizes = [4, 16, 16], strides = [1, 1, 1]} : vector<4x16x22xf32> to vector<4x16x16xf32>
    %20 = arith.maximumf %18, %19 : vector<4x16x16xf32>
    %21 = vector.extract_strided_slice %13 {offsets = [0, 0, 4], sizes = [4, 16, 16], strides = [1, 1, 1]} : vector<4x16x22xf32> to vector<4x16x16xf32>
    %22 = arith.maximumf %20, %21 : vector<4x16x16xf32>
    %23 = vector.extract_strided_slice %13 {offsets = [0, 0, 5], sizes = [4, 16, 16], strides = [1, 1, 1]} : vector<4x16x22xf32> to vector<4x16x16xf32>
    %24 = arith.maximumf %22, %23 : vector<4x16x16xf32>
    %25 = vector.extract_strided_slice %13 {offsets = [0, 0, 6], sizes = [4, 16, 16], strides = [1, 1, 1]} : vector<4x16x22xf32> to vector<4x16x16xf32>
    %26 = arith.maximumf %24, %25 : vector<4x16x16xf32>
    %27 = vector.shape_cast %26 : vector<4x16x16xf32> to vector<1x4x16x16xf32>
    %cst = arith.constant dense<0.000000e+00> : vector<1xf32>
    %28 = vector.multi_reduction <add>, %27, %cst [1, 2, 3] : vector<1x4x16x16xf32> to vector<1xf32>
    %29 = vector.shape_cast %28 : vector<1xf32> to vector<1x1x1x1xf32>
    %30 = vector.extract %29[0, 0, 0, 0] : f32 from vector<1x1x1x1xf32>
    %c0_2 = arith.constant 0 : index
    %31 = memref.load %arg3[%c0_2] : memref<1xf32, #tpu.memory_space<smem>>
    memref.store %30, %arg3[%c0_2] : memref<1xf32, #tpu.memory_space<smem>>
    %c0_3 = arith.constant 0 : index
    %32 = memref.load %arg0[%c0_3] : memref<1xf32, #tpu.memory_space<smem>>
    %cst_4 = arith.constant 1.000000e+00 : f32
    %33 = arith.subf %cst_4, %32 : f32
    %34 = vector.broadcast %33 : f32 to vector<4x16x16xf32>
    %35 = arith.mulf %34, %26 : vector<4x16x16xf32>
    %c0_5 = arith.constant 0 : index
    %c0_6 = arith.constant 0 : index
    %c0_7 = arith.constant 0 : index
    %36 = vector.load %arg2[%c0_5, %c0_6, %c0_7] : memref<4x16x16xf32, #tpu.memory_space<vmem>>, vector<4x16x16xf32>
    tpu.vector_store %arg2[%c0_5, %c0_6, %c0_7], %35 {strides = array<i32>} : memref<4x16x16xf32, #tpu.memory_space<vmem>>, vector<4x16x16xf32>,
    return
  }
}

</mosaic_0001>

<bundles_post_ra>
// kernel: tpu_custom_call.1
= control target key start
LH: loop header
LB: loop body
LE: loop exit
PB: predicated region body
PF: predicated region fallthrough
CT: control target
= control target key end

     0   :  { %10 = vsyncpa [#allocation4], 0  ;;  %vm40_vm0 = vcmask 1046528   ;;  %vm77_vm1 = vcmask 1045504   ;;  %vm114_vm2 = vcmask 1044480   ;;  %vm151_vm3 = vcmask 1043456   ;;  %s933_s0 = inlined_call_operand.<no memory space> [shape: f32[1], index: 0, kind: input, shape index: {}]   ;;  %s934_s1 = inlined_call_operand.vmem [shape: f32[4,22,22], index: 1, kind: input, shape index: {}]   ;;  %s935_s2 = inlined_call_operand.hbm [shape: f32[4,16,16], index: 2, kind: output, shape index: {0}]   ;;  %s936_s3 = inlined_call_operand.hbm [shape: f32[1], index: 3, kind: output, shape index: {1}]  }
   0x1   :  { %v19_v0 = vld [vmem:[%s934_s1 + $0x18] sm:$0xff]  ;;  %v621_v1 = vld [vmem:[%s934_s1 + $0x20] sm:$0xff]  ;;  %vm188_vm4 = vcmask 1042432   ;;  %v17_v14 = vld [vmem:[%s934_s1 + $0x8] sm:$0xff]  ;;  %vm225_vm5 = vcmask 1041408  }
   0x2   :  { %v46_v2 = vrot.slane %v19_v0, 1  ;;  %v47_v3 = vrot.slane %v621_v1, 1  ;;  %v83_v4 = vrot.slane %v19_v0, 2  ;;  %v84_v5 = vrot.slane %v621_v1, 2  ;;  %v16_v10 = vld [vmem:[%s934_s1] sm:$0xff] }
   0x3   :  { %v120_v6 = vrot.slane %v19_v0, 3  ;;  %v121_v7 = vrot.slane %v621_v1, 3  ;;  %v157_v8 = vrot.slane %v19_v0, 4  ;;  %v158_v9 = vrot.slane %v621_v1, 4  ;;  %v18_v34 = vld [vmem:[%s934_s1 + $0x10] sm:$0x3f] }
   0x4   :  { %v48_v11 = vsel %vm40_vm0, %v46_v2, %v47_v3  ;;  %v85_v12 = vsel %vm77_vm1, %v83_v4, %v84_v5  ;;  %v194_v13 = vrot.slane %v19_v0, 5  ;;  %v195_v18 = vrot.slane %v621_v1, 5 }
   0x5   :  { %v71_v15 = vmax.f32 %v19_v0, %v48_v11  ;;  %v122_v16 = vsel %vm114_vm2, %v120_v6, %v121_v7  ;;  %v159_v17 = vsel %vm151_vm3, %v157_v8, %v158_v9  ;;  %v231_v19 = vrot.slane %v19_v0, 6 }
   0x6   :  { %v232_v20 = vrot.slane %v621_v1, 6  ;;  %v41_v21 = vrot.slane %v16_v10, 1  ;;  %v196_v23 = vsel %vm188_vm4, %v194_v13, %v195_v18  ;;  %v42_v24 = vrot.slane %v17_v14, 1 }
   0x7   :  { %v108_v22 = vmax.f32 %v71_v15, %v85_v12  ;;  %v78_v25 = vrot.slane %v16_v10, 2  ;;  %v79_v27 = vrot.slane %v17_v14, 2  ;;  %v115_v28 = vrot.slane %v16_v10, 3 }
   0x8   :  { %v233_v26 = vsel %vm225_vm5, %v231_v19, %v232_v20  ;;  %v116_v29 = vrot.slane %v17_v14, 3  ;;  %v43_v31 = vsel %vm40_vm0, %v41_v21, %v42_v24  ;;  %v152_v32 = vrot.slane %v16_v10, 4 }
   0x9   :  { %v145_v30 = vmax.f32 %v108_v22, %v122_v16  ;;  %v153_v33 = vrot.slane %v17_v14, 4 }
   0xa   :  { %11 = vsyncpa [#allocation5], 0  ;;  %v69_v35 = vmax.f32 %v16_v10, %v43_v31  ;;  %v80_v36 = vsel %vm77_vm1, %v78_v25, %v79_v27  ;;  %v117_v37 = vsel %vm114_vm2, %v115_v28, %v116_v29  ;;  %v189_v38 = vrot.slane %v16_v10, 5  ;;  %v21_v51 = vld [vmem:[%s934_s1 + $0x28] sm:$0x3f]  ;;  %s585_s24 = smov 127  }
   0xb   :  { %v182_v39 = vmax.f32 %v145_v30, %v159_v17  ;;  %v154_v40 = vsel %vm151_vm3, %v152_v32, %v153_v33  ;;  %v190_v41 = vrot.slane %v17_v14, 5  ;;  %v226_v42 = vrot.slane %v16_v10, 6  ;;  %v22_v13 = vld [vmem:[%s934_s1 + $0x30] sm:$0xff]  ;;  %s586_s29 = smov 126   ;;  %s587_s9 = smov 125  }
   0xc   :  { %v106_v43 = vmax.f32 %v69_v35, %v80_v36  ;;  %v227_v44 = vrot.slane %v17_v14, 6  ;;  %v44_v45 = vrot.slane %v18_v34, 1  ;;  %v81_v46 = vrot.slane %v18_v34, 2  ;;  %s588_s12 = smov 124   ;;  %s590_s13 = smov 122  }
   0xd   :  { %v219_v47 = vmax.f32 %v182_v39, %v196_v23  ;;  %v191_v48 = vsel %vm188_vm4, %v189_v38, %v190_v41  ;;  %v118_v49 = vrot.slane %v18_v34, 3  ;;  %v155_v50 = vrot.slane %v18_v34, 4  ;;  %s490_s16 = ssub.f32 1.0, %s933_s0  ;;  %s591_s0 = smov [#allocation3]  }
   0xe   :  { %v143_v52 = vmax.f32 %v106_v43, %v117_v37  ;;  %v228_v53 = vsel %vm225_vm5, %v226_v42, %v227_v44  ;;  %v45_v54 = vsel %vm40_vm0, %v42_v24, %v44_v45  ;;  %v82_v55 = vsel %vm77_vm1, %v79_v27, %v81_v46  ;;  %s513_s17 = sshll.u32 %s591_s0, 4  ;;  %s514_s17 = int_to_ptr.vmem [resolvable:$true] %s513_s17 }
   0xf   :  { %v667_v56 = vmax.f32 %v219_v47, %v233_v26  ;;  %v70_v57 = vmax.f32 %v17_v14, %v45_v54  ;;  %v119_v58 = vsel %vm114_vm2, %v116_v29, %v118_v49  ;;  %v156_v59 = vsel %vm151_vm3, %v153_v33, %v155_v50  ;;  %v684_v14 = vld [vmem:[%s934_s1 + $0x38] sm:$0xff]  ;;  %v737_v54 = vld [vmem:[%s934_s1 + $0x50] sm:$0xff]  ;;  %s549_s18 = scalar_lea.vmem %s514_s17, 1024  ;;  %p554_p1 = scmp.lt.s32.totalorder %s514_s17, %s514_s17 }
  0x10   :  { %v180_v60 = vmax.f32 %v143_v52, %v154_v40  ;;  %v192_v61 = vrot.slane %v18_v34, 5  ;;  %v229_v62 = vrot.slane %v18_v34, 6  ;;  %v49_v63 = vrot.slane %v21_v51, 1  ;;  %p550_p0 = scmp.ne.s32.totalorder %s514_s17, %s549_s18  ;;  %p555_p2 = scmp.lt.s32.totalorder %s549_s18, %s549_s18 }
  0x11   :  { %274 = vrot.lane.b32.xlu1 %v667_v56, %s585_s24  ;;  %v107_v0 = vmax.f32 %v70_v57, %v82_v55  ;;  %v86_v2 = vrot.slane %v21_v51, 2  ;;  %v123_v4 = vrot.slane %v21_v51, 3  ;;  %v160_v6 = vrot.slane %v21_v51, 4 }
  0x12   :  { %v217_v8 = vmax.f32 %v180_v60, %v191_v48  ;;  %v193_v10 = vsel %vm188_vm4, %v190_v41, %v192_v61  ;;  %v230_v11 = vsel %vm225_vm5, %v227_v44, %v229_v62  ;;  %v50_v12 = vsel %vm40_vm0, %v47_v3, %v49_v63  ;;  %p556_p3 = por %p555_p2, %p554_p1 }
  0x13   :  { %v144_v15 = vmax.f32 %v107_v0, %v119_v58  ;;  %v72_v16 = vmax.f32 %v621_v1, %v50_v12  ;;  %v87_v17 = vsel %vm77_vm1, %v84_v5, %v86_v2  ;;  %v124_v3 = vsel %vm114_vm2, %v121_v7, %v123_v4  ;;  %v24_v1 = vld [vmem:[%s934_s1 + $0x40] sm:$0x3f] }
  0x14   :  { %v693_v19 = vmax.f32 %v217_v8, %v228_v53  ;;  %v161_v21 = vsel %vm151_vm3, %v158_v9, %v160_v6  ;;  %v197_v22 = vrot.slane %v21_v51, 5  ;;  %v234_v23 = vrot.slane %v21_v51, 6  ;;  %v732_v53 = vld [vmem:[%s934_s1 + $0x48] sm:$0xff]  ;;  %p557_p4 = pnand %p556_p3, %p550_p0 }
  0x15   :  { %v181_v24 = vmax.f32 %v144_v15, %v156_v59  ;;  %v109_v25 = vmax.f32 %v72_v16, %v87_v17  ;;  %v51_v26 = vrot.slane %v22_v13, 1  ;;  %v52_v27 = vrot.slane %v684_v14, 1 }
  0x16   :  { %270 = vrot.lane.b32.xlu0 %v693_v19, %s585_s24  ;;  %302 = vrot.lane.b32.xlu1 %v693_v19, %s586_s29  ;;  %v198_v5 = vsel %vm188_vm4, %v195_v18, %v197_v22  ;;  %v235_v7 = vsel %vm225_vm5, %v232_v20, %v234_v23  ;;  %v88_v9 = vrot.slane %v22_v13, 2  ;;  %v89_v28 = vrot.slane %v684_v14, 2  ;;  %v27_v23 = vld [vmem:[%s934_s1 + $0x58] sm:$0x3f]  ;;  %s589_s1 = smov 123  }
  0x17   :  { %v218_v29 = vmax.f32 %v181_v24, %v193_v10  ;;  %v146_v30 = vmax.f32 %v109_v25, %v124_v3  ;;  %v53_v31 = vsel %vm40_vm0, %v51_v26, %v52_v27  ;;  %v125_v32 = vrot.slane %v22_v13, 3 }
  0x18   :  { %v73_v33 = vmax.f32 %v22_v13, %v53_v31  ;;  %v90_v34 = vsel %vm77_vm1, %v88_v9, %v89_v28  ;;  %v126_v35 = vrot.slane %v684_v14, 3  ;;  %v162_v36 = vrot.slane %v22_v13, 4 }
  0x19   :  { %v716_v18 = vmax.f32 %v218_v29, %v230_v11  ;;  %v183_v20 = vmax.f32 %v146_v30, %v161_v21  ;;  %v163_v37 = vrot.slane %v684_v14, 4  ;;  %v199_v38 = vrot.slane %v22_v13, 5 }
  0x1a   :  { %v110_v39 = vmax.f32 %v73_v33, %v90_v34  ;;  %v127_v40 = vsel %vm114_vm2, %v125_v32, %v126_v35  ;;  %v200_v41 = vrot.slane %v684_v14, 5  ;;  %v236_v42 = vrot.slane %v22_v13, 6 }
  0x1b   :  { %272 = vrot.lane.b32.xlu0 %v716_v18, %s585_s24  ;;  %v220_v43 = vmax.f32 %v183_v20, %v198_v5  ;;  %v164_v44 = vsel %vm151_vm3, %v162_v36, %v163_v37  ;;  %v237_v45 = vrot.slane %v684_v14, 6  ;;  %v54_v46 = vrot.slane %v24_v1, 1 }
  0x1c   :  { %v147_v47 = vmax.f32 %v110_v39, %v127_v40  ;;  %v91_v48 = vrot.slane %v24_v1, 2  ;;  %v128_v49 = vrot.slane %v24_v1, 3  ;;  %v201_v51 = vsel %vm188_vm4, %v199_v38, %v200_v41 }
  0x1d   :  { %v725_v50 = vmax.f32 %v220_v43, %v235_v7  ;;  %v55_v52 = vsel %vm40_vm0, %v52_v27, %v54_v46  ;;  %v238_v59 = vsel %vm225_vm5, %v236_v42, %v237_v45  ;;  %v165_v61 = vrot.slane %v24_v1, 4 }
  0x1e   :  { %v184_v55 = vmax.f32 %v147_v47, %v164_v44  ;;  %v74_v57 = vmax.f32 %v684_v14, %v55_v52  ;;  %v92_v58 = vsel %vm77_vm1, %v89_v28, %v91_v48  ;;  %v129_v60 = vsel %vm114_vm2, %v126_v35, %v128_v49 }
  0x1f   :  { %276 = vrot.lane.b32.xlu1 %v725_v50, %s585_s24  ;;  %304 = vrot.lane.b32.xlu0 %v716_v18, %s586_s29  ;;  %v56_v0 = vrot.slane %v732_v53, 1  ;;  %v57_v2 = vrot.slane %v737_v54, 1  ;;  %v166_v8 = vsel %vm151_vm3, %v163_v37, %v165_v61  ;;  %v202_v10 = vrot.slane %v24_v1, 5 }
  0x20   :  { %v221_v62 = vmax.f32 %v184_v55, %v201_v51  ;;  %v111_v63 = vmax.f32 %v74_v57, %v92_v58  ;;  %v93_v12 = vrot.slane %v732_v53, 2  ;;  %v94_v13 = vrot.slane %v737_v54, 2 }
  0x21   :  { %v58_v11 = vsel %vm40_vm0, %v56_v0, %v57_v2  ;;  %v239_v15 = vrot.slane %v24_v1, 6  ;;  %v203_v17 = vsel %vm188_vm4, %v200_v41, %v202_v10  ;;  %v130_v21 = vrot.slane %v732_v53, 3 }
  0x22   :  { %v753_v4 = vmax.f32 %v221_v62, %v238_v59  ;;  %v148_v6 = vmax.f32 %v111_v63, %v129_v60  ;;  %v75_v16 = vmax.f32 %v732_v53, %v58_v11  ;;  %v95_v3 = vsel %vm77_vm1, %v93_v12, %v94_v13 }
  0x23   :  { %334 = vrot.lane.b32.xlu1 %v693_v19, %s587_s9  ;;  %306 = vrot.lane.b32.xlu0 %v667_v56, %s586_s29  ;;  %v131_v22 = vrot.slane %v737_v54, 3  ;;  %v240_v25 = vsel %vm225_vm5, %v237_v45, %v239_v15  ;;  %v167_v5 = vrot.slane %v732_v53, 4  ;;  %v168_v7 = vrot.slane %v737_v54, 4 }
  0x24   :  { %v185_v14 = vmax.f32 %v148_v6, %v166_v8  ;;  %v112_v26 = vmax.f32 %v75_v16, %v95_v3  ;;  %v59_v9 = vrot.slane %v27_v23, 1  ;;  %v204_v30 = vrot.slane %v732_v53, 5 }
  0x25   :  { %v132_v27 = vsel %vm114_vm2, %v130_v21, %v131_v22  ;;  %v169_v31 = vsel %vm151_vm3, %v167_v5, %v168_v7  ;;  %v205_v32 = vrot.slane %v737_v54, 5  ;;  %v96_v34 = vrot.slane %v27_v23, 2 }
  0x26   :  { %v222_v24 = vmax.f32 %v185_v14, %v203_v17  ;;  %v149_v29 = vmax.f32 %v112_v26, %v132_v27  ;;  %v60_v33 = vsel %vm40_vm0, %v57_v2, %v59_v9  ;;  %v241_v36 = vrot.slane %v732_v53, 6 }
  0x27   :  { %278 = vrot.lane.b32.xlu1 %v753_v4, %s585_s24  ;;  %336 = vrot.lane.b32.xlu0 %v716_v18, %s587_s9  ;;  %v76_v1 = vmax.f32 %v737_v54, %v60_v33  ;;  %v206_v20 = vsel %vm188_vm4, %v204_v30, %v205_v32  ;;  %v242_v37 = vrot.slane %v737_v54, 6  ;;  %v97_v38 = vsel %vm77_vm1, %v94_v13, %v96_v34 }
  0x28   :  { %v783_v28 = vmax.f32 %v222_v24, %v240_v25  ;;  %v186_v35 = vmax.f32 %v149_v29, %v169_v31  ;;  %v133_v39 = vrot.slane %v27_v23, 3  ;;  %v170_v44 = vrot.slane %v27_v23, 4 }
  0x29   :  { %v113_v41 = vmax.f32 %v76_v1, %v97_v38  ;;  %v243_v42 = vsel %vm225_vm5, %v241_v36, %v242_v37  ;;  %v207_v48 = vrot.slane %v27_v23, 5  ;;  %v244_v52 = vrot.slane %v27_v23, 6 }
  0x2a   :  { %v223_v40 = vmax.f32 %v186_v35, %v206_v20  ;;  %v134_v43 = vsel %vm114_vm2, %v131_v22, %v133_v39  ;;  %v171_v47 = vsel %vm151_vm3, %v168_v7, %v170_v44  ;;  %v874_v31 = vstv %s490_s16 }
  0x2b   :  { %338 = vrot.lane.b32.xlu1 %v667_v56, %s587_s9  ;;  %308 = vrot.lane.b32.xlu0 %v725_v50, %s586_s29  ;;  %v150_v46 = vmax.f32 %v113_v41, %v134_v43  ;;  %v208_v51 = vsel %vm188_vm4, %v205_v32, %v207_v48  ;;  %v245_v54 = vsel %vm225_vm5, %v242_v37, %v244_v52  ;;  %vm462_vm6 = vcmask 130048  }
  0x2c   :  { %v808_v45 = vmax.f32 %v223_v40, %v243_v42 }
  0x2d   :  { %v187_v49 = vmax.f32 %v150_v46, %v171_v47 }
  0x2f   :  { %368 = vrot.lane.b32.xlu1 %v716_v18, %s588_s12  ;;  %366 = vrot.lane.b32.xlu0 %v693_v19, %s588_s12  ;;  %v224_v53 = vmax.f32 %v187_v49, %v208_v51 }
  0x31   :  { %v824_v55 = vmax.f32 %v224_v53, %v245_v54 }
  0x33   :  { %310 = vrot.lane.b32.xlu1 %v753_v4, %s586_s29  ;;  %280 = vrot.lane.b32.xlu0 %v783_v28, %s585_s24 }
  0x37   :  { %370 = vrot.lane.b32.xlu1 %v667_v56, %s588_s12  ;;  %340 = vrot.lane.b32.xlu0 %v725_v50, %s587_s9 }
  0x3b   :  { %400 = vrot.lane.b32.xlu1 %v716_v18, %s589_s1  ;;  %398 = vrot.lane.b32.xlu0 %v693_v19, %s589_s1 }
  0x3f   :  { %312 = vrot.lane.b32.xlu1 %v783_v28, %s586_s29  ;;  %282 = vrot.lane.b32.xlu0 %v808_v45, %s585_s24 }
  0x43   :  { %372 = vrot.lane.b32.xlu1 %v725_v50, %s588_s12  ;;  %342 = vrot.lane.b32.xlu0 %v753_v4, %s587_s9 }
  0x47   :  { %430 = vrot.lane.b32.xlu1 %v693_v19, %s590_s13  ;;  %402 = vrot.lane.b32.xlu0 %v667_v56, %s589_s1 }
  0x4b   :  { %284 = vrot.lane.b32.xlu1 %v824_v55, %s585_s24  ;;  %432 = vrot.lane.b32.xlu0 %v716_v18, %s590_s13 }
  0x4f   :  { %344 = vrot.lane.b32.xlu1 %v783_v28, %s587_s9  ;;  %314 = vrot.lane.b32.xlu0 %v808_v45, %s586_s29 }
  0x53   :  { %404 = vrot.lane.b32.xlu1 %v725_v50, %s589_s1  ;;  %374 = vrot.lane.b32.xlu0 %v753_v4, %s588_s12 }
  0x57   :  { %316 = vrot.lane.b32.xlu1 %v824_v55, %s586_s29  ;;  %434 = vrot.lane.b32.xlu0 %v667_v56, %s590_s13 }
  0x5b   :  { %376 = vrot.lane.b32.xlu1 %v783_v28, %s588_s12  ;;  %346 = vrot.lane.b32.xlu0 %v808_v45, %s587_s9 }
  0x5f   :  { %436 = vrot.lane.b32.xlu1 %v725_v50, %s590_s13  ;;  %406 = vrot.lane.b32.xlu0 %v753_v4, %s589_s1 }
  0x63   :  { %378 = vrot.lane.b32.xlu1 %v808_v45, %s588_s12  ;;  %348 = vrot.lane.b32.xlu0 %v824_v55, %s587_s9 }
  0x67   :  { %438 = vrot.lane.b32.xlu1 %v753_v4, %s590_s13  ;;  %408 = vrot.lane.b32.xlu0 %v783_v28, %s589_s1 }
  0x6b   :  { %410 = vrot.lane.b32.xlu1 %v808_v45, %s589_s1  ;;  %380 = vrot.lane.b32.xlu0 %v824_v55, %s588_s12 }
  0x6f   :  { %412 = vrot.lane.b32.xlu1 %v824_v55, %s589_s1  ;;  %440 = vrot.lane.b32.xlu0 %v783_v28, %s590_s13 }
  0x73   :  { %444 = vrot.lane.b32.xlu1 %v824_v55, %s590_s13  ;;  %442 = vrot.lane.b32.xlu0 %v808_v45, %s590_s13 }
  0x83   :  { %v275_v57 = vpop.permute.xlu1 %274 }
  0x84   :  { %v296_v37 = vmax.f32 %v667_v56, %v275_v57 }
  0x88   :  { %v271_v58 = vpop.permute.xlu0 %270  ;;  %v303_v59 = vpop.permute.xlu1 %302 }
  0x89   :  { %v294_v21 = vmax.f32 %v693_v19, %v271_v58 }
  0x8b   :  { %v326_v24 = vmax.f32 %v294_v21, %v303_v59 }
  0x8d   :  { %v273_v60 = vpop.permute.xlu0 %272 }
  0x8e   :  { %v295_v25 = vmax.f32 %v716_v18, %v273_v60 }
  0x91   :  { %v277_v61 = vpop.permute.xlu1 %276  ;;  %v305_v62 = vpop.permute.xlu0 %304 }
  0x92   :  { %v327_v7 = vmax.f32 %v295_v25, %v305_v62  ;;  %v297_v47 = vmax.f32 %v725_v50, %v277_v61 }
  0x95   :  { %v335_v63 = vpop.permute.xlu1 %334  ;;  %v307_v0 = vpop.permute.xlu0 %306 }
  0x96   :  { %v358_v26 = vmax.f32 %v326_v24, %v335_v63  ;;  %v328_v41 = vmax.f32 %v296_v37, %v307_v0 }
  0x99   :  { %v863_v2 = vpop.permute.xlu1 %278  ;;  %v337_v6 = vpop.permute.xlu0 %336 }
  0x9a   :  { %v359_v29 = vmax.f32 %v327_v7, %v337_v6  ;;  %v298_v60 = vmax.f32 %v753_v4, %v863_v2 }
  0x9d   :  { %v339_v8 = vpop.permute.xlu1 %338  ;;  %v309_v10 = vpop.permute.xlu0 %308 }
  0x9e   :  { %v360_v42 = vmax.f32 %v328_v41, %v339_v8  ;;  %v329_v52 = vmax.f32 %v297_v47, %v309_v10 }
  0xa1   :  { %v369_v11 = vpop.permute.xlu1 %368  ;;  %v367_v12 = vpop.permute.xlu0 %366 }
  0xa2   :  { %v390_v9 = vmax.f32 %v358_v26, %v367_v12  ;;  %v391_v33 = vmax.f32 %v359_v29, %v369_v11 }
  0xa5   :  { %v311_v13 = vpop.permute.xlu1 %310  ;;  %v865_v14 = vpop.permute.xlu0 %280 }
  0xa6   :  { %v330_v50 = vmax.f32 %v298_v60, %v311_v13 }
  0xa9   :  { %v371_v15 = vpop.permute.xlu1 %370  ;;  %v341_v16 = vpop.permute.xlu0 %340 }
  0xaa   :  { %v392_v46 = vmax.f32 %v360_v42, %v371_v15  ;;  %v361_v54 = vmax.f32 %v329_v52, %v341_v16  ;;  %v299_v15 = vmax.f32 %v783_v28, %v865_v14 }
  0xad   :  { %v401_v17 = vpop.permute.xlu1 %400  ;;  %v399_v3 = vpop.permute.xlu0 %398 }
  0xae   :  { %v422_v30 = vmax.f32 %v390_v9, %v399_v3  ;;  %v423_v35 = vmax.f32 %v391_v33, %v401_v17 }
  0xb1   :  { %v313_v22 = vpop.permute.xlu1 %312  ;;  %v868_v23 = vpop.permute.xlu0 %282 }
  0xb2   :  { %v331_v4 = vmax.f32 %v299_v15, %v313_v22  ;;  %v300_v13 = vmax.f32 %v808_v45, %v868_v23 }
  0xb5   :  { %v373_v27 = vpop.permute.xlu1 %372  ;;  %v343_v5 = vpop.permute.xlu0 %342 }
  0xb6   :  { %v393_v59 = vmax.f32 %v361_v54, %v373_v27  ;;  %v362_v6 = vmax.f32 %v330_v50, %v343_v5 }
  0xb9   :  { %v431_v19 = vpop.permute.xlu1 %430  ;;  %v403_v32 = vpop.permute.xlu0 %402 }
  0xba   :  { %v454_v34 = vmax.f32 %v422_v30, %v431_v19  ;;  %v424_v48 = vmax.f32 %v392_v46, %v403_v32 }
  0xbc   :  { %v492_v18 = vmul.f32 %v874_v31, %v454_v34  ;;  %v463_v27 = vsel %vm462_vm6, %v454_v34, 0.0 }
  0xbd   :  { %v285_v36 = vpop.permute.xlu1 %284  ;;  %v433_v1 = vpop.permute.xlu0 %432 }
  0xbe   :  { %500 = vst.msk [vmem:[#allocation3] sm:$0xff] %vm462_vm6, %v492_v18  ;;  %v455_v20 = vmax.f32 %v423_v35, %v433_v1  ;;  %v301_v21 = vmax.f32 %v824_v55, %v285_v36 }
  0xc0   :  { %v493_v38 = vmul.f32 %v874_v31, %v455_v20  ;;  %v464_v24 = vsel %vm462_vm6, %v455_v20, 0.0 }
  0xc1   :  { %v345_v39 = vpop.permute.xlu1 %344  ;;  %v315_v40 = vpop.permute.xlu0 %314  ;;  %v465_v29 = vadd.f32 %v464_v24, %v463_v27 }
  0xc2   :  { %501 = vst.msk [vmem:[#allocation3 + $0x8] sm:$0xff] %vm462_vm6, %v493_v38  ;;  %v363_v25 = vmax.f32 %v331_v4, %v345_v39  ;;  %v332_v28 = vmax.f32 %v300_v13, %v315_v40 }
  0xc5   :  { %v405_v43 = vpop.permute.xlu1 %404  ;;  %v375_v44 = vpop.permute.xlu0 %374 }
  0xc6   :  { %v425_v62 = vmax.f32 %v393_v59, %v405_v43  ;;  %v394_v12 = vmax.f32 %v362_v6, %v375_v44 }
  0xc9   :  { %v317_v49 = vpop.permute.xlu1 %316  ;;  %v435_v51 = vpop.permute.xlu0 %434 }
  0xca   :  { %v456_v53 = vmax.f32 %v424_v48, %v435_v51  ;;  %v333_v14 = vmax.f32 %v301_v21, %v317_v49 }
  0xcc   :  { %v494_v56 = vmul.f32 %v874_v31, %v456_v53  ;;  %v466_v9 = vsel %vm462_vm6, %v456_v53, 0.0 }
  0xcd   :  { %v377_v57 = vpop.permute.xlu1 %376  ;;  %v347_v58 = vpop.permute.xlu0 %346  ;;  %v467_v19 = vadd.f32 %v466_v9, %v465_v29 }
  0xce   :  { %502 = vst.msk [vmem:[#allocation3 + $0x10] sm:$0xff] %vm462_vm6, %v494_v56  ;;  %v395_v22 = vmax.f32 %v363_v25, %v377_v57  ;;  %v364_v45 = vmax.f32 %v332_v28, %v347_v58 }
  0xd1   :  { %v437_v63 = vpop.permute.xlu1 %436  ;;  %v407_v0 = vpop.permute.xlu0 %406 }
  0xd2   :  { %v457_v61 = vmax.f32 %v425_v62, %v437_v63  ;;  %v426_v16 = vmax.f32 %v394_v12, %v407_v0 }
  0xd4   :  { %v495_v8 = vmul.f32 %v874_v31, %v457_v61  ;;  %v468_v55 = vsel %vm462_vm6, %v457_v61, 0.0 }
  0xd5   :  { %v379_v10 = vpop.permute.xlu1 %378  ;;  %v349_v11 = vpop.permute.xlu0 %348  ;;  %v469_v1 = vadd.f32 %v468_v55, %v467_v19 }
  0xd6   :  { %503 = vst.msk [vmem:[#allocation3 + $0x18] sm:$0xff] %vm462_vm6, %v495_v8  ;;  %v365_v23 = vmax.f32 %v333_v14, %v349_v11  ;;  %v396_v35 = vmax.f32 %v364_v45, %v379_v10 }
  0xd9   :  { %v439_v17 = vpop.permute.xlu1 %438  ;;  %v409_v3 = vpop.permute.xlu0 %408 }
  0xda   :  { %v458_v2 = vmax.f32 %v426_v16, %v439_v17  ;;  %v427_v30 = vmax.f32 %v395_v22, %v409_v3 }
  0xdc   :  { %v496_v26 = vmul.f32 %v874_v31, %v458_v2  ;;  %v470_v34 = vsel %vm462_vm6, %v458_v2, 0.0 }
  0xdd   :  { %v411_v5 = vpop.permute.xlu1 %410  ;;  %v381_v7 = vpop.permute.xlu0 %380  ;;  %v471_v40 = vadd.f32 %v470_v34, %v469_v1 }
  0xde   :  { %504 = vst.msk [vmem:[#allocation3 + $0x20] sm:$0xff] %vm462_vm6, %v496_v26  ;;  %v397_v18 = vmax.f32 %v365_v23, %v381_v7  ;;  %v428_v20 = vmax.f32 %v396_v35, %v411_v5 }
  0xe1   :  { %v413_v32 = vpop.permute.xlu1 %412  ;;  %v441_v33 = vpop.permute.xlu0 %440 }
  0xe2   :  { %v459_v36 = vmax.f32 %v427_v30, %v441_v33  ;;  %v429_v37 = vmax.f32 %v397_v18, %v413_v32 }
  0xe4   :  { %v472_v38 = vsel %vm462_vm6, %v459_v36, 0.0  ;;  %v497_v39 = vmul.f32 %v874_v31, %v459_v36 }
  0xe5   :  { %v445_v41 = vpop.permute.xlu1 %444  ;;  %v443_v42 = vpop.permute.xlu0 %442  ;;  %v473_v46 = vadd.f32 %v472_v38, %v471_v40 }
  0xe6   :  { %505 = vst.msk [vmem:[#allocation3 + $0x28] sm:$0xff] %vm462_vm6, %v497_v39  ;;  %v461_v43 = vmax.f32 %v429_v37, %v445_v41  ;;  %v460_v44 = vmax.f32 %v428_v20, %v443_v42 }
  0xe8   :  { %v499_v47 = vmul.f32 %v874_v31, %v461_v43  ;;  %v474_v48 = vsel %vm462_vm6, %v460_v44, 0.0  ;;  %v498_v49 = vmul.f32 %v874_v31, %v460_v44  ;;  %v476_v52 = vsel %vm462_vm6, %v461_v43, 0.0 }
  0xe9   :  { %v475_v51 = vadd.f32 %v474_v48, %v473_v46 }
  0xea   :  { %507 = vst.msk [vmem:[#allocation3 + $0x38] sm:$0xff] %vm462_vm6, %v499_v47  ;;  %506 = vst.msk [vmem:[#allocation3 + $0x30] sm:$0xff] %vm462_vm6, %v498_v49 }
  0xeb   :  { %v477_v53 = vadd.f32 %v476_v52, %v475_v51 }
  0xed   :  { %478 = vadd.xlane.f32.xlu0 %v477_v53 }
  0xee   :  { %560 = shalt.err (!%p557_p4)
}
  0xef   :  { %s561_s21 = scalar_lea.hbm %s935_s2, 1024 }
  0xf0   :  { %p562_p5 = scmp.ne.s32.totalorder %s935_s2, %s561_s21  ;;  %p565_p6 = scmp.lt.u32.totalorder %s561_s21, %s935_s2 }
  0xf2   :  { %p567_p7 = pnand %p565_p6, %p562_p5 }
  0xf4   :  { %570 = shalt.err (!%p567_p7)
}
  0xf5   :  { %s592_s26 = smov 128   ;;  %s593_s27 = smov 8  }
  0xf6   :  { %519 = dma.vmem_to_hbm [thread:$0]  %s514_s17, 1024, %s935_s2, [#allocation4], %s592_s26, %s592_s26, %s593_s27  }
  0xf7   :  { %s571_s6 = scalar_lea.hbm %s936_s3, 16 }
  0xf8   :  { %p572_p8 = scmp.ne.s32.totalorder %s936_s3, %s571_s6  ;;  %p575_p9 = scmp.lt.u32.totalorder %s571_s6, %s936_s3 }
  0xfa   :  { %p577_p10 = pnand %p575_p9, %p572_p8 }
 0x17a   :  { %v479_v31 = vpop.xlane.xlu0 %478 }
 0x17b   :  { %v480_v54 = vrot.slane %v479_v31, 4 }
 0x17d   :  { %v481_v56 = vadd.f32 %v480_v54, %v479_v31 }
 0x17f   :  { %v482_v57 = vrot.slane %v481_v56, 2 }
 0x181   :  { %v483_v58 = vadd.f32 %v482_v57, %v481_v56 }
 0x183   :  { %v484_v59 = vrot.slane %v483_v58, 1 }
 0x185   :  { %v485_v60 = vadd.f32 %v484_v59, %v483_v58 }
 0x187   :  { %537 = vpush %v485_v60 }
 0x1b8   :  { %s538_s30 = spop %537 }
 0x1b9   :  { %488 = sst [smem:[#allocation6]] %s538_s30 }
 0x1ba   :  { %580 = shalt.err (!%p577_p10)
}
 0x1bb   :  { %s594_s10 = smov [#allocation6]  }
 0x1bc   :  { %527 = dma.smem_to_hbm %s594_s10, 16, %s936_s3, [#allocation5]  }
 0x1bd   :  { %581 = dma.done.wait [#allocation4], 1024  }
 0x1be   :  { %582 = vsyncadd [#allocation4], 4294966272 }
 0x1bf   :  { %583 = dma.done.wait [#allocation5], 16  }
 0x1c0   :  { %584 = vsyncadd [#allocation5], 4294967280 }
 0x1c1   :  { %534 = sfence }
 0x1c2   :  { %535 = vsyncpa [#allocation4], 1 }
 0x1c3   :  { %536 = vsyncpa [#allocation5], 1 }

</bundles_post_ra>
